<compile_context>
chip_gen: v7x
topology: tpu7x:2x2x1
jax: 0.10.0
libtpu: 0.0.40
codegen_flags: <defaults>
</compile_context>

<pallas_src>
import functools

import numpy as np
import jax
import jax.numpy as jnp
from jax.experimental import pallas as pl
from jax.experimental.pallas import tpu as pltpu


# ----------------------------------------------------------------------------
# Deterministic "parameter" setup: the fixed (non-trainable) Gaussian kernel.
# Mirrors build_gauss_kernel() from the PyTorch script exactly (including its
# quirks: exp(...)**2 and kernel[i, j] = g(i) + g(j), then normalized).
# ----------------------------------------------------------------------------
def build_gauss_kernel_np(size=5, sigma=1.0):
    if size % 2 != 1:
        raise ValueError("kernel size must be uneven")
    grid = np.float32(np.mgrid[0:size, 0:size].T)
    gaussian = lambda x: np.exp((x - size // 2) ** 2 / (-2 * sigma ** 2)) ** 2
    kernel = np.sum(gaussian(grid), axis=2)
    kernel /= np.sum(kernel)
    return np.asarray(kernel, dtype=np.float32)  # (size, size)


def _gauss_taps(size, sigma):
    t = np.arange(size, dtype=np.float64)
    return np.exp((t - size // 2) ** 2 / (-2.0 * sigma ** 2)) ** 2


# ----------------------------------------------------------------------------
# Constant-matrix builders (numpy, trace time).  Replicate (clamped) boundary
# handling is folded directly into the banded matrix coefficients.
# ----------------------------------------------------------------------------
def _conv_matrix_right(length, taps):
    """(z @ M)[r, i] == sum_j taps[j] * z[r, clip(i + j - pad, 0, length-1)]."""
    k = len(taps)
    pad = k // 2
    m = np.zeros((length, length), dtype=np.float64)
    for i in range(length):
        for j in range(k):
            src = min(max(i + j - pad, 0), length - 1)
            m[src, i] += taps[j]
    return m


def _pool2_matrix_right(length):
    """(z @ P)[r, q] == z[r, 2q] + z[r, 2q+1]  (floor mode: odd tail dropped)."""
    out = length // 2
    p = np.zeros((length, out), dtype=np.float64)
    for q in range(out):
        p[2 * q, q] = 1.0
        p[2 * q + 1, q] = 1.0
    return p


def _build_level_constants(H, W, n_planes, k_size, sigma, max_levels):
    """Per-level, per-plane banded constant matrices + per-level L1 weights.

    Per level l with plane dims (h, w), applied as plain 2-D matmuls:
      box_w   (w, w)       right: 5-tap box sum along W (replicate clamped)
      gauss_w (w, w)       right: 5-tap gauss along W
      gauss_h (h, h)       left : 5-tap gauss along H, scaled 1/S
      box_h   (h, h)       left : 5-tap box  along H, scaled 1/S
      pool_h  (h//2, h)    left : 2x row pool, scaled 1/4
      pool_w  (w, w//2)    right: 2x col pool
    """
    g = _gauss_taps(k_size, sigma)
    box = np.ones(k_size, dtype=np.float64)
    s = 2.0 * float(k_size) * float(np.sum(g))  # sum of the 2-D kernel

    entries, weights = [], []
    h, w = H, W
    for _ in range(max_levels):
        if h < 2 or w < 2:
            raise ValueError(
                "LapLoss: spatial dims must be >= 2**max_levels "
                f"(hit a {h}x{w} level)")
        entries.extend([
            _conv_matrix_right(w, box),
            _conv_matrix_right(w, g),
            _conv_matrix_right(h, g).T / s,
            _conv_matrix_right(h, box).T / s,
            _pool2_matrix_right(h).T * 0.25,
            _pool2_matrix_right(w),
        ])
        weights.append(1.0 / float(n_planes * h * w))  # F.l1_loss 'mean'
        h, w = h // 2, w // 2
    final_weight = 1.0 / float(n_planes * h * w)
    entries = [np.asarray(m, dtype=np.float32) for m in entries]
    return entries, weights, final_weight


def _pack_constants(entries, lane_width):
    """Pack all constant matrices into ONE (R, lane_width) f32 buffer.

    Each matrix sits top-left in its own 8-row-aligned band so the in-kernel
    static slices are sublane-tile aligned (zero-cost views).
    """
    offsets, shapes = [], []
    row = 0
    for m in entries:
        offsets.append(row)
        shapes.append((int(m.shape[0]), int(m.shape[1])))
        row += -(-m.shape[0] // 8) * 8            # round rows up to 8
    buf = np.zeros((max(row, 8), lane_width), dtype=np.float32)
    for off, m in zip(offsets, entries):
        r, c = m.shape
        buf[off:off + r, :c] = m
    return buf, offsets, shapes


# ----------------------------------------------------------------------------
# The Pallas kernel: one channel plane per grid step, all pyramid levels.
# ----------------------------------------------------------------------------
def _lap_loss_kernel(x_ref, y_ref, mats_ref, o_ref, *,
                     num_levels, offsets, shapes, level_weights, final_weight):
    """Per-plane Laplacian-pyramid L1 partial loss.

    x_ref, y_ref : (H, W) f32 VMEM  -- one N*C channel plane (grid dim squeezed)
    mats_ref     : (R, CW) f32 VMEM -- packed constant matrices (grid-resident)
    o_ref        : (8, 128) f32 VMEM -- partial loss broadcast over the tile
    """
    def mat(i):
        off = offsets[i]
        r, c = shapes[i]
        return mats_ref[off:off + r, :c]

    # Linearity of the whole pyramid: compute it on d = x - y only.
    d = x_ref[...] - y_ref[...]
    total = jnp.float32(0.0)

    for lvl in range(num_levels):
        b = 6 * lvl
        box_w = mat(b + 0)     # (w, w)
        gauss_w = mat(b + 1)   # (w, w)
        gauss_h = mat(b + 2)   # (h, h), 1/S folded in
        box_h = mat(b + 3)     # (h, h), 1/S folded in
        pool_h = mat(b + 4)    # (h//2, h), 0.25 folded in
        pool_w = mat(b + 5)    # (w, w//2)

        # 5x5 replicate-padded depthwise blur via the rank-2 decomposition
        #   K[i,j] = (g(i)+g(j))/S
        #   blur   = (1/S) * [ gauss_H(box_W(d)) + box_H(gauss_W(d)) ]
        zb = jnp.dot(d, box_w, preferred_element_type=jnp.float32)
        zg = jnp.dot(d, gauss_w, preferred_element_type=jnp.float32)
        blur = (jnp.dot(gauss_h, zb, preferred_element_type=jnp.float32)
                + jnp.dot(box_h, zg, preferred_element_type=jnp.float32))

        # Laplacian residual of d == pyr(x)_lvl - pyr(y)_lvl (exact, linear).
        total = total + jnp.sum(jnp.abs(d - blur)) * level_weights[lvl]

        # 2x2 average pool (floor mode) -> next level.
        # TODO(synk): levels with dims <= 8 are sub-tile MXU fill/drain; they
        # could move to VPU/XLU rolls, but at these sizes they are free filler.
        d = jnp.dot(jnp.dot(pool_h, blur, preferred_element_type=jnp.float32),
                    pool_w, preferred_element_type=jnp.float32)

    # Final (coarsest) low-pass level.
    total = total + jnp.sum(jnp.abs(d)) * final_weight

    # Lane-dense unmasked (8,128) store of the per-plane partial loss.
    o_ref[...] = jnp.full(o_ref.shape, total, dtype=o_ref.dtype)


# ----------------------------------------------------------------------------
# Wrapper: LapLoss.forward
# ----------------------------------------------------------------------------
def lap_loss(x, y, *, max_levels=5, k_size=5, sigma=2.0):
    if x.ndim != 4 or x.shape != y.shape:
        raise ValueError("lap_loss expects two NCHW tensors of equal shape")
    x = x.astype(jnp.float32)
    y = y.astype(jnp.float32)
    N, C, H, W = x.shape
    n_planes = N * C

    entries, level_weights, final_weight = _build_level_constants(
        H, W, n_planes, k_size, sigma, max_levels)
    mats_buf, offsets, shapes = _pack_constants(entries, max(H, W))
    R, CW = mats_buf.shape

    # Free reshapes only (no transpose / concat / pre-subtraction in XLA).
    x3 = x.reshape(n_planes, H, W)
    y3 = y.reshape(n_planes, H, W)

    kernel = functools.partial(
        _lap_loss_kernel,
        num_levels=max_levels,
        offsets=tuple(offsets),
        shapes=tuple(shapes),
        level_weights=tuple(level_weights),
        final_weight=final_weight)

    # VMEM budget: resident constants (x2 pipeline buffers), double-buffered
    # (H, W) input blocks, double-buffered (8,128) output tiles, plus headroom
    # for intermediates.  Clamped to v7x's 64 MiB per-TensorCore VMEM.
    vmem_limit = int(min(max(2 * mats_buf.nbytes
                             + 2 * 2 * H * W * 4
                             + 2 * 8 * 128 * 4
                             + (2 << 20),
                             4 << 20),
                         64 << 20))

    partial_losses = pl.pallas_call(
        kernel,
        out_shape=jax.ShapeDtypeStruct((n_planes, 8, 128), jnp.float32),
        grid=(n_planes,),
        in_specs=[
            pl.BlockSpec((None, H, W), lambda p: (p, 0, 0)),
            pl.BlockSpec((None, H, W), lambda p: (p, 0, 0)),
            pl.BlockSpec((R, CW), lambda p: (0, 0)),   # grid-resident constants
        ],
        out_specs=pl.BlockSpec((None, 8, 128), lambda p: (p, 0, 0)),
        compiler_params=pltpu.CompilerParams(
            dimension_semantics=("parallel",),   # v7x: planes split across TCs
            vmem_limit_bytes=vmem_limit),
    )(x3, y3, jnp.asarray(mats_buf))

    return jnp.sum(partial_losses[:, 0, 0])


# ----------------------------------------------------------------------------
# Pure-JAX reference (direct 2-D depthwise conv + reduce_window pooling).
# ----------------------------------------------------------------------------
def _ref_lap_loss(x, y, max_levels=5, k_size=5, sigma=2.0):
    gk = build_gauss_kernel_np(size=k_size, sigma=sigma)
    C = x.shape[1]
    w = jnp.asarray(np.tile(gk[None, None], (C, 1, 1, 1)))  # (C, 1, k, k)
    p = k_size // 2

    def conv_gauss(img):
        img = jnp.pad(img, ((0, 0), (0, 0), (p, p), (p, p)), mode="edge")
        return jax.lax.conv_general_dilated(
            img, w, window_strides=(1, 1), padding="VALID",
            dimension_numbers=("NCHW", "OIHW", "NCHW"),
            feature_group_count=C, precision=jax.lax.Precision.HIGHEST)

    def avg_pool2(img):
        s = jax.lax.reduce_window(
            img, 0.0, jax.lax.add,
            window_dimensions=(1, 1, 2, 2), window_strides=(1, 1, 2, 2),
            padding="VALID")
        return s / 4.0

    def pyramid(img):
        cur = img
        pyr = []
        for _ in range(max_levels):
            f = conv_gauss(cur)
            pyr.append(cur - f)
            cur = avg_pool2(f)
        pyr.append(cur)
        return pyr

    pa, pb = pyramid(x), pyramid(y)
    return sum(jnp.mean(jnp.abs(a - b)) for a, b in zip(pa, pb))


if __name__ == "__main__":
    key = jax.random.PRNGKey(0)
    k1, k2 = jax.random.split(key)
    # batch=2, channels=3, spatial=32 (>= 2**max_levels so all 5 levels exist)
    x = jax.random.uniform(k1, (2, 3, 32, 32), dtype=jnp.float32)
    y = jax.random.uniform(k2, (2, 3, 32, 32), dtype=jnp.float32)

    loss_fn = jax.jit(functools.partial(lap_loss, max_levels=5, k_size=5, sigma=2.0))
    out = loss_fn(x, y)
    jax.block_until_ready(out)

    ref = _ref_lap_loss(x, y)
    # Kernel computes the pyramid of (x - y) (mathematically identical by
    # linearity); tolerance absorbs MXU f32 precision-mode differences and
    # reassociation vs the HIGHEST-precision two-pyramid XLA reference.
    np.testing.assert_allclose(np.asarray(out), np.asarray(ref),
                               rtol=1e-2, atol=1e-3)
    print("KERNEL_OK")
</pallas_src>

<mosaic_0001>
module attributes {stable_mosaic.version = 11 : i64} {
  func.func @_lap_loss_kernel(%arg0: i32, %arg1: memref<1x32x32xf32, #tpu.memory_space<vmem>>, %arg2: memref<1x32x32xf32, #tpu.memory_space<vmem>>, %arg3: memref<408x32xf32, #tpu.memory_space<vmem>>, %arg4: memref<1x8x128xf32, #tpu.memory_space<vmem>>) attributes {dimension_semantics = [#tpu.dimension_semantics<parallel>], iteration_bounds = array<i64: 6>, scalar_prefetch = 0 : i64, scratch_operands = 0 : i64, tpu.core_type = #tpu.core_type<tc>, window_params = [{transform_indices = @transform_0, window_bounds = array<i64: 1, 32, 32>}, {transform_indices = @transform_1, window_bounds = array<i64: 1, 32, 32>}, {pipeline_mode = #tpu.pipeline_mode<synchronous>, transform_indices = @transform_2, window_bounds = array<i64: 408, 32>}, {transform_indices = @transform_3, window_bounds = array<i64: 1, 8, 128>}]} {
    %c0 = arith.constant 0 : index
    %c0_0 = arith.constant 0 : index
    %c0_1 = arith.constant 0 : index
    %0 = vector.load %arg1[%c0, %c0_0, %c0_1] : memref<1x32x32xf32, #tpu.memory_space<vmem>>, vector<1x32x32xf32>
    %1 = vector.shape_cast %0 : vector<1x32x32xf32> to vector<32x32xf32>
    %c0_2 = arith.constant 0 : index
    %c0_3 = arith.constant 0 : index
    %c0_4 = arith.constant 0 : index
    %2 = vector.load %arg2[%c0_2, %c0_3, %c0_4] : memref<1x32x32xf32, #tpu.memory_space<vmem>>, vector<1x32x32xf32>
    %3 = vector.shape_cast %2 : vector<1x32x32xf32> to vector<32x32xf32>
    %4 = arith.subf %1, %3 : vector<32x32xf32>
    %c0_5 = arith.constant 0 : index
    %c0_6 = arith.constant 0 : index
    %5 = vector.load %arg3[%c0_5, %c0_6] : memref<408x32xf32, #tpu.memory_space<vmem>>, vector<32x32xf32>
    %c32 = arith.constant 32 : index
    %c0_7 = arith.constant 0 : index
    %6 = vector.load %arg3[%c32, %c0_7] : memref<408x32xf32, #tpu.memory_space<vmem>>, vector<32x32xf32>
    %c64 = arith.constant 64 : index
    %c0_8 = arith.constant 0 : index
    %7 = vector.load %arg3[%c64, %c0_8] : memref<408x32xf32, #tpu.memory_space<vmem>>, vector<32x32xf32>
    %c96 = arith.constant 96 : index
    %c0_9 = arith.constant 0 : index
    %8 = vector.load %arg3[%c96, %c0_9] : memref<408x32xf32, #tpu.memory_space<vmem>>, vector<32x32xf32>
    %c128 = arith.constant 128 : index
    %c0_10 = arith.constant 0 : index
    %9 = vector.load %arg3[%c128, %c0_10] : memref<408x32xf32, #tpu.memory_space<vmem>>, vector<16x32xf32>
    %c144 = arith.constant 144 : index
    %c0_11 = arith.constant 0 : index
    %10 = vector.load %arg3[%c144, %c0_11] : memref<408x32xf32, #tpu.memory_space<vmem>>, vector<32x16xf32>
    %cst = arith.constant dense<0.000000e+00> : vector<32x32xf32>
    %11 = tpu.matmul %4, %5, %cst {dimension_numbers = #tpu.dot_dimension_numbers<[1], [0], [0], [1], [0, 0, 1, 1], [], []>} : vector<32x32xf32>, vector<32x32xf32>, vector<32x32xf32> -> vector<32x32xf32>
    %cst_12 = arith.constant dense<0.000000e+00> : vector<32x32xf32>
    %12 = tpu.matmul %4, %6, %cst_12 {dimension_numbers = #tpu.dot_dimension_numbers<[1], [0], [0], [1], [0, 0, 1, 1], [], []>} : vector<32x32xf32>, vector<32x32xf32>, vector<32x32xf32> -> vector<32x32xf32>
    %cst_13 = arith.constant dense<0.000000e+00> : vector<32x32xf32>
    %13 = tpu.matmul %7, %11, %cst_13 {dimension_numbers = #tpu.dot_dimension_numbers<[1], [0], [0], [1], [0, 0, 1, 1], [], []>} : vector<32x32xf32>, vector<32x32xf32>, vector<32x32xf32> -> vector<32x32xf32>
    %cst_14 = arith.constant dense<0.000000e+00> : vector<32x32xf32>
    %14 = tpu.matmul %8, %12, %cst_14 {dimension_numbers = #tpu.dot_dimension_numbers<[1], [0], [0], [1], [0, 0, 1, 1], [], []>} : vector<32x32xf32>, vector<32x32xf32>, vector<32x32xf32> -> vector<32x32xf32>
    %15 = arith.addf %13, %14 : vector<32x32xf32>
    %16 = arith.subf %4, %15 : vector<32x32xf32>
    %17 = math.absf %16 : vector<32x32xf32>
    %18 = vector.shape_cast %17 : vector<32x32xf32> to vector<1x32x32xf32>
    %cst_15 = arith.constant dense<0.000000e+00> : vector<1xf32>
    %19 = vector.multi_reduction <add>, %18, %cst_15 [1, 2] : vector<1x32x32xf32> to vector<1xf32>
    %20 = vector.shape_cast %19 : vector<1xf32> to vector<1x1x1xf32>
    %21 = vector.extract %20[0, 0, 0] : f32 from vector<1x1x1xf32>
    %cst_16 = arith.constant 1.62760422E-4 : f32
    %22 = arith.mulf %21, %cst_16 : f32
    %cst_17 = arith.constant 0.000000e+00 : f32
    %23 = arith.addf %cst_17, %22 : f32
    %cst_18 = arith.constant dense<0.000000e+00> : vector<16x32xf32>
    %24 = tpu.matmul %9, %15, %cst_18 {dimension_numbers = #tpu.dot_dimension_numbers<[1], [0], [0], [1], [0, 0, 1, 1], [], []>} : vector<16x32xf32>, vector<32x32xf32>, vector<16x32xf32> -> vector<16x32xf32>
    %cst_19 = arith.constant dense<0.000000e+00> : vector<16x16xf32>
    %25 = tpu.matmul %24, %10, %cst_19 {dimension_numbers = #tpu.dot_dimension_numbers<[1], [0], [0], [1], [0, 0, 1, 1], [], []>} : vector<16x32xf32>, vector<32x16xf32>, vector<16x16xf32> -> vector<16x16xf32>
    %c176 = arith.constant 176 : index
    %c0_20 = arith.constant 0 : index
    %26 = vector.load %arg3[%c176, %c0_20] : memref<408x32xf32, #tpu.memory_space<vmem>>, vector<16x16xf32>
    %c192 = arith.constant 192 : index
    %c0_21 = arith.constant 0 : index
    %27 = vector.load %arg3[%c192, %c0_21] : memref<408x32xf32, #tpu.memory_space<vmem>>, vector<16x16xf32>
    %c208 = arith.constant 208 : index
    %c0_22 = arith.constant 0 : index
    %28 = vector.load %arg3[%c208, %c0_22] : memref<408x32xf32, #tpu.memory_space<vmem>>, vector<16x16xf32>
    %c224 = arith.constant 224 : index
    %c0_23 = arith.constant 0 : index
    %29 = vector.load %arg3[%c224, %c0_23] : memref<408x32xf32, #tpu.memory_space<vmem>>, vector<16x16xf32>
    %c240 = arith.constant 240 : index
    %c0_24 = arith.constant 0 : index
    %30 = vector.load %arg3[%c240, %c0_24] : memref<408x32xf32, #tpu.memory_space<vmem>>, vector<8x16xf32>
    %c248 = arith.constant 248 : index
    %c0_25 = arith.constant 0 : index
    %31 = vector.load %arg3[%c248, %c0_25] : memref<408x32xf32, #tpu.memory_space<vmem>>, vector<16x8xf32>
    %cst_26 = arith.constant dense<0.000000e+00> : vector<16x16xf32>
    %32 = tpu.matmul %25, %26, %cst_26 {dimension_numbers = #tpu.dot_dimension_numbers<[1], [0], [0], [1], [0, 0, 1, 1], [], []>} : vector<16x16xf32>, vector<16x16xf32>, vector<16x16xf32> -> vector<16x16xf32>
    %cst_27 = arith.constant dense<0.000000e+00> : vector<16x16xf32>
    %33 = tpu.matmul %25, %27, %cst_27 {dimension_numbers = #tpu.dot_dimension_numbers<[1], [0], [0], [1], [0, 0, 1, 1], [], []>} : vector<16x16xf32>, vector<16x16xf32>, vector<16x16xf32> -> vector<16x16xf32>
    %cst_28 = arith.constant dense<0.000000e+00> : vector<16x16xf32>
    %34 = tpu.matmul %28, %32, %cst_28 {dimension_numbers = #tpu.dot_dimension_numbers<[1], [0], [0], [1], [0, 0, 1, 1], [], []>} : vector<16x16xf32>, vector<16x16xf32>, vector<16x16xf32> -> vector<16x16xf32>
    %cst_29 = arith.constant dense<0.000000e+00> : vector<16x16xf32>
    %35 = tpu.matmul %29, %33, %cst_29 {dimension_numbers = #tpu.dot_dimension_numbers<[1], [0], [0], [1], [0, 0, 1, 1], [], []>} : vector<16x16xf32>, vector<16x16xf32>, vector<16x16xf32> -> vector<16x16xf32>
    %36 = arith.addf %34, %35 : vector<16x16xf32>
    %37 = arith.subf %25, %36 : vector<16x16xf32>
    %38 = math.absf %37 : vector<16x16xf32>
    %39 = vector.shape_cast %38 : vector<16x16xf32> to vector<1x16x16xf32>
    %cst_30 = arith.constant dense<0.000000e+00> : vector<1xf32>
    %40 = vector.multi_reduction <add>, %39, %cst_30 [1, 2] : vector<1x16x16xf32> to vector<1xf32>
    %41 = vector.shape_cast %40 : vector<1xf32> to vector<1x1x1xf32>
    %42 = vector.extract %41[0, 0, 0] : f32 from vector<1x1x1xf32>
    %cst_31 = arith.constant 6.51041686E-4 : f32
    %43 = arith.mulf %42, %cst_31 : f32
    %44 = arith.addf %23, %43 : f32
    %cst_32 = arith.constant dense<0.000000e+00> : vector<8x16xf32>
    %45 = tpu.matmul %30, %36, %cst_32 {dimension_numbers = #tpu.dot_dimension_numbers<[1], [0], [0], [1], [0, 0, 1, 1], [], []>} : vector<8x16xf32>, vector<16x16xf32>, vector<8x16xf32> -> vector<8x16xf32>
    %cst_33 = arith.constant dense<0.000000e+00> : vector<8x8xf32>
    %46 = tpu.matmul %45, %31, %cst_33 {dimension_numbers = #tpu.dot_dimension_numbers<[1], [0], [0], [1], [0, 0, 1, 1], [], []>} : vector<8x16xf32>, vector<16x8xf32>, vector<8x8xf32> -> vector<8x8xf32>
    %c264 = arith.constant 264 : index
    %c0_34 = arith.constant 0 : index
    %47 = vector.load %arg3[%c264, %c0_34] : memref<408x32xf32, #tpu.memory_space<vmem>>, vector<8x8xf32>
    %c272 = arith.constant 272 : index
    %c0_35 = arith.constant 0 : index
    %48 = vector.load %arg3[%c272, %c0_35] : memref<408x32xf32, #tpu.memory_space<vmem>>, vector<8x8xf32>
    %c280 = arith.constant 280 : index
    %c0_36 = arith.constant 0 : index
    %49 = vector.load %arg3[%c280, %c0_36] : memref<408x32xf32, #tpu.memory_space<vmem>>, vector<8x8xf32>
    %c288 = arith.constant 288 : index
    %c0_37 = arith.constant 0 : index
    %50 = vector.load %arg3[%c288, %c0_37] : memref<408x32xf32, #tpu.memory_space<vmem>>, vector<8x8xf32>
    %c296 = arith.constant 296 : index
    %c0_38 = arith.constant 0 : index
    %51 = vector.load %arg3[%c296, %c0_38] : memref<408x32xf32, #tpu.memory_space<vmem>>, vector<4x8xf32>
    %c304 = arith.constant 304 : index
    %c0_39 = arith.constant 0 : index
    %52 = vector.load %arg3[%c304, %c0_39] : memref<408x32xf32, #tpu.memory_space<vmem>>, vector<8x4xf32>
    %cst_40 = arith.constant dense<0.000000e+00> : vector<8x8xf32>
    %53 = tpu.matmul %46, %47, %cst_40 {dimension_numbers = #tpu.dot_dimension_numbers<[1], [0], [0], [1], [0, 0, 1, 1], [], []>} : vector<8x8xf32>, vector<8x8xf32>, vector<8x8xf32> -> vector<8x8xf32>
    %cst_41 = arith.constant dense<0.000000e+00> : vector<8x8xf32>
    %54 = tpu.matmul %46, %48, %cst_41 {dimension_numbers = #tpu.dot_dimension_numbers<[1], [0], [0], [1], [0, 0, 1, 1], [], []>} : vector<8x8xf32>, vector<8x8xf32>, vector<8x8xf32> -> vector<8x8xf32>
    %cst_42 = arith.constant dense<0.000000e+00> : vector<8x8xf32>
    %55 = tpu.matmul %49, %53, %cst_42 {dimension_numbers = #tpu.dot_dimension_numbers<[1], [0], [0], [1], [0, 0, 1, 1], [], []>} : vector<8x8xf32>, vector<8x8xf32>, vector<8x8xf32> -> vector<8x8xf32>
    %cst_43 = arith.constant dense<0.000000e+00> : vector<8x8xf32>
    %56 = tpu.matmul %50, %54, %cst_43 {dimension_numbers = #tpu.dot_dimension_numbers<[1], [0], [0], [1], [0, 0, 1, 1], [], []>} : vector<8x8xf32>, vector<8x8xf32>, vector<8x8xf32> -> vector<8x8xf32>
    %57 = arith.addf %55, %56 : vector<8x8xf32>
    %58 = arith.subf %46, %57 : vector<8x8xf32>
    %59 = math.absf %58 : vector<8x8xf32>
    %60 = vector.shape_cast %59 : vector<8x8xf32> to vector<1x8x8xf32>
    %cst_44 = arith.constant dense<0.000000e+00> : vector<1xf32>
    %61 = vector.multi_reduction <add>, %60, %cst_44 [1, 2] : vector<1x8x8xf32> to vector<1xf32>
    %62 = vector.shape_cast %61 : vector<1xf32> to vector<1x1x1xf32>
    %63 = vector.extract %62[0, 0, 0] : f32 from vector<1x1x1xf32>
    %cst_45 = arith.constant 0.00260416674 : f32
    %64 = arith.mulf %63, %cst_45 : f32
    %65 = arith.addf %44, %64 : f32
    %cst_46 = arith.constant dense<0.000000e+00> : vector<4x8xf32>
    %66 = tpu.matmul %51, %57, %cst_46 {dimension_numbers = #tpu.dot_dimension_numbers<[1], [0], [0], [1], [0, 0, 1, 1], [], []>} : vector<4x8xf32>, vector<8x8xf32>, vector<4x8xf32> -> vector<4x8xf32>
    %cst_47 = arith.constant dense<0.000000e+00> : vector<4x4xf32>
    %67 = tpu.matmul %66, %52, %cst_47 {dimension_numbers = #tpu.dot_dimension_numbers<[1], [0], [0], [1], [0, 0, 1, 1], [], []>} : vector<4x8xf32>, vector<8x4xf32>, vector<4x4xf32> -> vector<4x4xf32>
    %c312 = arith.constant 312 : index
    %c0_48 = arith.constant 0 : index
    %68 = vector.load %arg3[%c312, %c0_48] : memref<408x32xf32, #tpu.memory_space<vmem>>, vector<4x4xf32>
    %c320 = arith.constant 320 : index
    %c0_49 = arith.constant 0 : index
    %69 = vector.load %arg3[%c320, %c0_49] : memref<408x32xf32, #tpu.memory_space<vmem>>, vector<4x4xf32>
    %c328 = arith.constant 328 : index
    %c0_50 = arith.constant 0 : index
    %70 = vector.load %arg3[%c328, %c0_50] : memref<408x32xf32, #tpu.memory_space<vmem>>, vector<4x4xf32>
    %c336 = arith.constant 336 : index
    %c0_51 = arith.constant 0 : index
    %71 = vector.load %arg3[%c336, %c0_51] : memref<408x32xf32, #tpu.memory_space<vmem>>, vector<4x4xf32>
    %c344 = arith.constant 344 : index
    %c0_52 = arith.constant 0 : index
    %72 = vector.load %arg3[%c344, %c0_52] : memref<408x32xf32, #tpu.memory_space<vmem>>, vector<2x4xf32>
    %c352 = arith.constant 352 : index
    %c0_53 = arith.constant 0 : index
    %73 = vector.load %arg3[%c352, %c0_53] : memref<408x32xf32, #tpu.memory_space<vmem>>, vector<4x2xf32>
    %cst_54 = arith.constant dense<0.000000e+00> : vector<4x4xf32>
    %74 = tpu.matmul %67, %68, %cst_54 {dimension_numbers = #tpu.dot_dimension_numbers<[1], [0], [0], [1], [0, 0, 1, 1], [], []>} : vector<4x4xf32>, vector<4x4xf32>, vector<4x4xf32> -> vector<4x4xf32>
    %cst_55 = arith.constant dense<0.000000e+00> : vector<4x4xf32>
    %75 = tpu.matmul %67, %69, %cst_55 {dimension_numbers = #tpu.dot_dimension_numbers<[1], [0], [0], [1], [0, 0, 1, 1], [], []>} : vector<4x4xf32>, vector<4x4xf32>, vector<4x4xf32> -> vector<4x4xf32>
    %cst_56 = arith.constant dense<0.000000e+00> : vector<4x4xf32>
    %76 = tpu.matmul %70, %74, %cst_56 {dimension_numbers = #tpu.dot_dimension_numbers<[1], [0], [0], [1], [0, 0, 1, 1], [], []>} : vector<4x4xf32>, vector<4x4xf32>, vector<4x4xf32> -> vector<4x4xf32>
    %cst_57 = arith.constant dense<0.000000e+00> : vector<4x4xf32>
    %77 = tpu.matmul %71, %75, %cst_57 {dimension_numbers = #tpu.dot_dimension_numbers<[1], [0], [0], [1], [0, 0, 1, 1], [], []>} : vector<4x4xf32>, vector<4x4xf32>, vector<4x4xf32> -> vector<4x4xf32>
    %78 = arith.addf %76, %77 : vector<4x4xf32>
    %79 = arith.subf %67, %78 : vector<4x4xf32>
    %80 = math.absf %79 : vector<4x4xf32>
    %81 = vector.shape_cast %80 : vector<4x4xf32> to vector<1x4x4xf32>
    %cst_58 = arith.constant dense<0.000000e+00> : vector<1xf32>
    %82 = vector.multi_reduction <add>, %81, %cst_58 [1, 2] : vector<1x4x4xf32> to vector<1xf32>
    %83 = vector.shape_cast %82 : vector<1xf32> to vector<1x1x1xf32>
    %84 = vector.extract %83[0, 0, 0] : f32 from vector<1x1x1xf32>
    %cst_59 = arith.constant 0.010416667 : f32
    %85 = arith.mulf %84, %cst_59 : f32
    %86 = arith.addf %65, %85 : f32
    %cst_60 = arith.constant dense<0.000000e+00> : vector<2x4xf32>
    %87 = tpu.matmul %72, %78, %cst_60 {dimension_numbers = #tpu.dot_dimension_numbers<[1], [0], [0], [1], [0, 0, 1, 1], [], []>} : vector<2x4xf32>, vector<4x4xf32>, vector<2x4xf32> -> vector<2x4xf32>
    %cst_61 = arith.constant dense<0.000000e+00> : vector<2x2xf32>
    %88 = tpu.matmul %87, %73, %cst_61 {dimension_numbers = #tpu.dot_dimension_numbers<[1], [0], [0], [1], [0, 0, 1, 1], [], []>} : vector<2x4xf32>, vector<4x2xf32>, vector<2x2xf32> -> vector<2x2xf32>
    %c360 = arith.constant 360 : index
    %c0_62 = arith.constant 0 : index
    %89 = vector.load %arg3[%c360, %c0_62] : memref<408x32xf32, #tpu.memory_space<vmem>>, vector<2x2xf32>
    %c368 = arith.constant 368 : index
    %c0_63 = arith.constant 0 : index
    %90 = vector.load %arg3[%c368, %c0_63] : memref<408x32xf32, #tpu.memory_space<vmem>>, vector<2x2xf32>
    %c376 = arith.constant 376 : index
    %c0_64 = arith.constant 0 : index
    %91 = vector.load %arg3[%c376, %c0_64] : memref<408x32xf32, #tpu.memory_space<vmem>>, vector<2x2xf32>
    %c384 = arith.constant 384 : index
    %c0_65 = arith.constant 0 : index
    %92 = vector.load %arg3[%c384, %c0_65] : memref<408x32xf32, #tpu.memory_space<vmem>>, vector<2x2xf32>
    %c392 = arith.constant 392 : index
    %c0_66 = arith.constant 0 : index
    %93 = vector.load %arg3[%c392, %c0_66] : memref<408x32xf32, #tpu.memory_space<vmem>>, vector<1x2xf32>
    %c400 = arith.constant 400 : index
    %c0_67 = arith.constant 0 : index
    %94 = vector.load %arg3[%c400, %c0_67] : memref<408x32xf32, #tpu.memory_space<vmem>>, vector<2x1xf32>
    %cst_68 = arith.constant dense<0.000000e+00> : vector<2x2xf32>
    %95 = tpu.matmul %88, %89, %cst_68 {dimension_numbers = #tpu.dot_dimension_numbers<[1], [0], [0], [1], [0, 0, 1, 1], [], []>} : vector<2x2xf32>, vector<2x2xf32>, vector<2x2xf32> -> vector<2x2xf32>
    %cst_69 = arith.constant dense<0.000000e+00> : vector<2x2xf32>
    %96 = tpu.matmul %88, %90, %cst_69 {dimension_numbers = #tpu.dot_dimension_numbers<[1], [0], [0], [1], [0, 0, 1, 1], [], []>} : vector<2x2xf32>, vector<2x2xf32>, vector<2x2xf32> -> vector<2x2xf32>
    %cst_70 = arith.constant dense<0.000000e+00> : vector<2x2xf32>
    %97 = tpu.matmul %91, %95, %cst_70 {dimension_numbers = #tpu.dot_dimension_numbers<[1], [0], [0], [1], [0, 0, 1, 1], [], []>} : vector<2x2xf32>, vector<2x2xf32>, vector<2x2xf32> -> vector<2x2xf32>
    %cst_71 = arith.constant dense<0.000000e+00> : vector<2x2xf32>
    %98 = tpu.matmul %92, %96, %cst_71 {dimension_numbers = #tpu.dot_dimension_numbers<[1], [0], [0], [1], [0, 0, 1, 1], [], []>} : vector<2x2xf32>, vector<2x2xf32>, vector<2x2xf32> -> vector<2x2xf32>
    %99 = arith.addf %97, %98 : vector<2x2xf32>
    %100 = arith.subf %88, %99 : vector<2x2xf32>
    %101 = math.absf %100 : vector<2x2xf32>
    %102 = vector.shape_cast %101 : vector<2x2xf32> to vector<1x2x2xf32>
    %cst_72 = arith.constant dense<0.000000e+00> : vector<1xf32>
    %103 = vector.multi_reduction <add>, %102, %cst_72 [1, 2] : vector<1x2x2xf32> to vector<1xf32>
    %104 = vector.shape_cast %103 : vector<1xf32> to vector<1x1x1xf32>
    %105 = vector.extract %104[0, 0, 0] : f32 from vector<1x1x1xf32>
    %cst_73 = arith.constant 0.0416666679 : f32
    %106 = arith.mulf %105, %cst_73 : f32
    %107 = arith.addf %86, %106 : f32
    %cst_74 = arith.constant dense<0.000000e+00> : vector<1x2xf32>
    %108 = tpu.matmul %93, %99, %cst_74 {dimension_numbers = #tpu.dot_dimension_numbers<[1], [0], [0], [1], [0, 0, 1, 1], [], []>} : vector<1x2xf32>, vector<2x2xf32>, vector<1x2xf32> -> vector<1x2xf32>
    %cst_75 = arith.constant dense<0.000000e+00> : vector<1x1xf32>
    %109 = tpu.matmul %108, %94, %cst_75 {dimension_numbers = #tpu.dot_dimension_numbers<[1], [0], [0], [1], [0, 0, 1, 1], [], []>} : vector<1x2xf32>, vector<2x1xf32>, vector<1x1xf32> -> vector<1x1xf32>
    %110 = math.absf %109 : vector<1x1xf32>
    %111 = vector.shape_cast %110 : vector<1x1xf32> to vector<1x1x1xf32>
    %cst_76 = arith.constant dense<0.000000e+00> : vector<1xf32>
    %112 = vector.multi_reduction <add>, %111, %cst_76 [1, 2] : vector<1x1x1xf32> to vector<1xf32>
    %113 = vector.shape_cast %112 : vector<1xf32> to vector<1x1x1xf32>
    %114 = vector.extract %113[0, 0, 0] : f32 from vector<1x1x1xf32>
    %cst_77 = arith.constant 0.166666672 : f32
    %115 = arith.mulf %114, %cst_77 : f32
    %116 = arith.addf %107, %115 : f32
    %117 = vector.broadcast %116 : f32 to vector<8x128xf32>
    %c0_78 = arith.constant 0 : index
    %c0_79 = arith.constant 0 : index
    %c0_80 = arith.constant 0 : index
    %118 = vector.load %arg4[%c0_78, %c0_79, %c0_80] : memref<1x8x128xf32, #tpu.memory_space<vmem>>, vector<1x8x128xf32>
    %119 = vector.shape_cast %118 : vector<1x8x128xf32> to vector<8x128xf32>
    %120 = vector.shape_cast %117 : vector<8x128xf32> to vector<1x8x128xf32>
    tpu.vector_store %arg4[%c0_78, %c0_79, %c0_80], %120 {strides = array<i32>} : memref<1x8x128xf32, #tpu.memory_space<vmem>>, vector<1x8x128xf32>,
    return
  }
  func.func @transform_0(%arg0: i32) -> (i32, i32, i32) {
    %c0_i32 = arith.constant 0 : i32
    %c0_i32_0 = arith.constant 0 : i32
    %c0_i32_1 = arith.constant 0 : i32
    return %arg0, %c0_i32, %c0_i32_0 : i32, i32, i32
  }
  func.func @transform_1(%arg0: i32) -> (i32, i32, i32) {
    %c0_i32 = arith.constant 0 : i32
    %c0_i32_0 = arith.constant 0 : i32
    %c0_i32_1 = arith.constant 0 : i32
    return %arg0, %c0_i32, %c0_i32_0 : i32, i32, i32
  }
  func.func @transform_2(%arg0: i32) -> (i32, i32) {
    %c0_i32 = arith.constant 0 : i32
    %c0_i32_0 = arith.constant 0 : i32
    %c0_i32_1 = arith.constant 0 : i32
    return %c0_i32, %c0_i32_0 : i32, i32
  }
  func.func @transform_3(%arg0: i32) -> (i32, i32, i32) {
    %c0_i32 = arith.constant 0 : i32
    %c0_i32_0 = arith.constant 0 : i32
    %c0_i32_1 = arith.constant 0 : i32
    return %arg0, %c0_i32, %c0_i32_0 : i32, i32, i32
  }
}

</mosaic_0001>

<bundles_post_ra>
// kernel: lap_loss.1
= control target key start
LH: loop header
LB: loop body
LE: loop exit
PB: predicated region body
PF: predicated region fallthrough
CT: control target
= control target key end

     0   :  { %8 = vsyncpa [#allocation3], 0  ;;  %s3893_s0 = inlined_call_operand.hbm [shape: f32[6,32,32], index: 0, kind: input, shape index: {}]   ;;  %s3894_s1 = inlined_call_operand.hbm [shape: f32[6,32,32], index: 1, kind: input, shape index: {}]   ;;  %s3895_s2 = inlined_call_operand.hbm [shape: f32[408,32], index: 2, kind: input, shape index: {}]   ;;  %s3896_s3 = inlined_call_operand.vmem [shape: f32[6,8,128], index: 3, kind: output, shape index: {}]  }
   0x1   :  { %10 = vsyncpa [#allocation3 + $0x1], 0 }
   0x2   :  { %11 = vsyncpa [#allocation5], 0 }
   0x3   :  { %13 = vsyncpa [#allocation5 + $0x1], 0  ;;  %s3553_s12 = smov 0   ;;  %s3555_s13 = smov 0  }
   0x4   :  { %s3557_s14 = smov 0   ;;  %s3559_s15 = smov 0  }
   0x5 LB: > { %s3572_s16 = sadd.s32 4294967295, %s3523_s15   ;;  %p39_p0 = scmp.ne.s32.totalorder %s3515_s13, %s3511_s12  ;;  %s3523_s15 = sphi %s3559_s15, %s3911_s15   ;;  %s3519_s14 = sphi %s3557_s14, %s3910_s14   ;;  %s3515_s13 = sphi %s3555_s13, %s3909_s13   ;;  %s3511_s12 = sphi %s3553_s12, %s3908_s12  }
   0x6   : > { %p3897_p1 = scmp.eq.s32.totalorder %s3572_s16, 0  ;;  %p2849_p2 = scmp.ge.s32.totalorder %s3523_s15, 1 }
   0x7   : > { %p123_p3 = scmp.lt.s32.totalorder %s3523_s15, 7  ;;  %s3525_s19 = smov [#allocation6]  }
   0x8   : > { %p3580_p4 = por %p3897_p1, %p39_p0  ;;  %s135_s20 = sshll.u32 %s3525_s19, 4  ;;  %s136_s20 = int_to_ptr.vmem [resolvable:$true] %s135_s20 }
   0x9   : > { %p3584_p5 = pnand %p2849_p2, %p123_p3  ;;  %s3597_s22 = sadd.s32 1, %s3523_s15  }
   0xa   : > { %s3900_s17 = scalar_select %p3580_p4, 1, 0 }
   0xb   : > { %s3901_s18 = scalar_select %p3584_p5, 1, 0 }
   0xc   : > { %p3341_p6 = pneg %p3584_p5  ;;  %s26_s23 = sadd.s32 1, %s3519_s14 }
   0xd   : > { %s23_s24 = ssub.s32 %s3523_s15, %s3597_s22  ;;  %s3393_s27 = scalar_lea.hbm %s3895_s2, 6528 }
   0xe   : > { %p3592_p7 = pnand %p3341_p6, %p3897_p1  ;;  %p3394_p8 = scmp.ne.s32.totalorder %s3895_s2, %s3393_s27 }
   0xf   : > { %p3400_p12 = scmp.lt.u32.totalorder %s3393_s27, %s3895_s2 }
  0x10   : > { %p3395_p9 = pneg %p3592_p7 }
  0x12   : > { %p3396_p10 = pnand %p3395_p9, %p3394_p8 }
  0x14   : > { %p3397_p11 = pneg %p3396_p10 }
  0x16   : > { %p3402_p13 = pnand %p3400_p12, %p3397_p11 }
  0x18   : > { %3405 = shalt.err (!%p3402_p13)
}
  0x19   : > { %s3406_s5 = scalar_lea.vmem %s136_s20, 6528  ;;  %p3414_p6 = scmp.lt.s32.totalorder %s136_s20, %s136_s20 }
  0x1a   : > { %p3407_p0 = scmp.ne.s32.totalorder %s136_s20, %s3406_s5  ;;  %p3415_p1 = scmp.lt.s32.totalorder %s3406_s5, %s3406_s5 }
  0x1c   : > { %p3409_p2 = pnand %p3407_p0, %p3395_p9  ;;  %p3416_p4 = por %p3415_p1, %p3414_p6 }
  0x1e   : > { %p3410_p3 = pneg %p3409_p2 }
  0x20   : > { %p3417_p5 = pnand %p3416_p4, %p3410_p3 }
  0x22   : > { %3420 = shalt.err (!%p3417_p5)
}
  0x23   : > { %s3526_s6 = smov 128   ;;  %s3527_s7 = smov 8  }
  0x24   : > { %3344 = dma.hbm_to_vmem [thread:$0]  (!%p3592_p7), %s3895_s2, 6528, %s136_s20, [#allocation5], %s3526_s6, %s3526_s6, %s3527_s7  }
  0x25   : > { %p24_p1 = scmp.eq.s32.totalorder %s23_s24, 0  ;;  %p33_p4 = scmp.ne.s32.totalorder %s3519_s14, %s3515_s13 }
  0x26   : > { %p34_p5 = scmp.eq.s32.totalorder %s3523_s15, 0  ;;  %p3353_p8 = scmp.lt.s32.totalorder %s3523_s15, 6 }
  0x27   : > { %s3626_s10 = scalar_select %p24_p1, %s3519_s14, %s26_s23  }
  0x28   : > { %p35_p9 = por %p34_p5, %p33_p4  ;;  %s149_s11 = sand.u32 1, %s3519_s14  }
  0x29   : > { %s2852_s12 = sshll.u32 %s149_s11, 5  ;;  %s2925_s19 = sshll.u32 %s3523_s15, 9 }
  0x2a   : > { %s3633_s21 = scalar_lea.hbm %s3893_s0, %s2925_s19  ;;  %s153_s27 = scalar_lea.vmem [#allocation2], %s2852_s12 }
  0x2b   : > { %s160_s20 = sshll.u32 %s153_s27, 4  ;;  %p3637_p7 = pnand %p3353_p8, %p35_p9  ;;  %s3635_s20 = int_to_ptr.vmem [resolvable:$true] %s160_s20 }
  0x2c   : > { %s3644_s29 = scalar_lea.hbm %s3894_s1, %s2925_s19  ;;  %s174_s30 = scalar_lea.vmem [#allocation4], %s2852_s12 }
  0x2d   : > { %s3646_s4 = sshll.u32 %s174_s30, 4  ;;  %s3648_s5 = scalar_lea.sflag [#allocation3], %s149_s11  ;;  %s3680_s4 = int_to_ptr.vmem [resolvable:$true] %s3646_s4 }
  0x2e   : > { %s3421_s8 = scalar_lea.hbm %s3633_s21, 512  ;;  %p3423_p11 = pneg %p3637_p7 }
  0x2f   : > { %p3422_p10 = scmp.ne.s32.totalorder %s3633_s21, %s3421_s8  ;;  %s3426_s26 = scalar_lea.hbm %s3893_s0, 3072 }
  0x30   : > { %p3427_p0 = scmp.lt.u32.totalorder %s3633_s21, %s3893_s0  ;;  %p3428_p2 = scmp.lt.u32.totalorder %s3426_s26, %s3421_s8 }
  0x31   : > { %p3424_p12 = pnand %p3423_p11, %p3422_p10  ;;  %p3430_p6 = scmp.lt.u32.totalorder %s3421_s8, %s3633_s21 }
  0x32   : > { %p3429_p3 = por %p3428_p2, %p3427_p0 }
  0x33   : > { %p3425_p13 = pneg %p3424_p12 }
  0x34   : > { %p3431_p1 = por %p3430_p6, %p3429_p3 }
  0x36   : > { %p3432_p4 = pnand %p3431_p1, %p3425_p13 }
  0x38   : > { %3435 = shalt.err (!%p3432_p4)
}
  0x39   : > { %s3436_s11 = scalar_lea.vmem %s3635_s20, 512  ;;  %s3528_s12 = smov [#allocation2]  }
  0x3a   : > { %p3437_p5 = scmp.ne.s32.totalorder %s3635_s20, %s3436_s11  ;;  %s3441_s24 = sshll.u32 %s3528_s12, 4  ;;  %s3442_s24 = int_to_ptr.vmem [resolvable:$false] %s3441_s24 }
  0x3b   : > { %s3443_s28 = scalar_lea.vmem %s3442_s24, 1024  ;;  %p3444_p10 = scmp.lt.s32.totalorder %s3635_s20, %s3442_s24 }
  0x3c   : > { %p3439_p8 = pnand %p3437_p5, %p3423_p11  ;;  %p3445_p12 = scmp.lt.s32.totalorder %s3443_s28, %s3436_s11 }
  0x3e   : > { %p3440_p9 = pneg %p3439_p8  ;;  %p3446_p0 = por %p3445_p12, %p3444_p10 }
  0x40   : > { %p3447_p2 = pnand %p3446_p0, %p3440_p9 }
  0x42   : > { %3450 = shalt.err (!%p3447_p2)
}
  0x43   : > { %3348 = dma.hbm_to_vmem [thread:$0]  (!%p3637_p7), %s3633_s21, 512, %s3635_s20, %s3648_s5, %s3526_s6, %s3526_s6, %s3527_s7  }
  0x44   : > { %s170_s30 = sand.u32 1, %s3523_s15   ;;  %s3451_s9 = scalar_lea.hbm %s3644_s29, 512 }
  0x45   : > { %s3683_s8 = scalar_lea.sflag [#allocation5], %s170_s30  ;;  %p3452_p13 = scmp.ne.s32.totalorder %s3644_s29, %s3451_s9 }
  0x46   : > { %s3456_s27 = scalar_lea.hbm %s3894_s1, 3072  ;;  %p3457_p1 = scmp.lt.u32.totalorder %s3644_s29, %s3894_s1 }
  0x47   : > { %p3454_p3 = pnand %p3452_p13, %p3423_p11  ;;  %p3458_p4 = scmp.lt.u32.totalorder %s3456_s27, %s3451_s9 }
  0x48   : > { %p3460_p8 = scmp.lt.u32.totalorder %s3451_s9, %s3644_s29 }
  0x49   : > { %p3455_p6 = pneg %p3454_p3  ;;  %p3459_p5 = por %p3458_p4, %p3457_p1 }
  0x4b   : > { %p3461_p9 = por %p3460_p8, %p3459_p5 }
  0x4d   : > { %p3462_p10 = pnand %p3461_p9, %p3455_p6 }
  0x4f   : > { %3465 = shalt.err (!%p3462_p10)
}
  0x50   : > { %s3466_s15 = scalar_lea.vmem %s3680_s4, 512  ;;  %s3529_s21 = smov [#allocation4]  }
  0x51   : > { %p3467_p12 = scmp.ne.s32.totalorder %s3680_s4, %s3466_s15  ;;  %s3471_s20 = sshll.u32 %s3529_s21, 4  ;;  %s3472_s20 = int_to_ptr.vmem [resolvable:$false] %s3471_s20 }
  0x52   : > { %s3473_s5 = scalar_lea.vmem %s3472_s20, 1024  ;;  %p3474_p13 = scmp.lt.s32.totalorder %s3680_s4, %s3472_s20 }
  0x53   : > { %p3469_p0 = pnand %p3467_p12, %p3423_p11  ;;  %p3475_p3 = scmp.lt.s32.totalorder %s3473_s5, %s3466_s15 }
  0x55   : > { %p3470_p2 = pneg %p3469_p0  ;;  %p3476_p1 = por %p3475_p3, %p3474_p13 }
  0x57   : > { %p3477_p4 = pnand %p3476_p1, %p3470_p2 }
  0x59   : > { %3480 = shalt.err (!%p3477_p4)
}
  0x5a   : > { %3351 = dma.hbm_to_vmem [thread:$0]  (!%p3637_p7), %s3644_s29, 512, %s3680_s4, %s3683_s8, %s3526_s6, %s3526_s6, %s3527_s7  }
  0x5b   : > { %p3904_p11 = scmp.ne.s32.totalorder %s3901_s18, 0 }
  0x5c   : > { %s195_s12 = sand.u32 (!%p3904_p11), 1, %s3515_s13   ;;  %p3905_p6 = scmp.ne.s32.totalorder (!%p3904_p11), %s3900_s17, 0 }
  0x5d   : > { %193 = sbr.rel (%p3904_p11) target bundleno = 4501 (0x1195), region = 32  ;;  %s2859_s24 = sshll.u32 (!%p3904_p11), %s195_s12, 5 }
  0x5e   : > { %s196_s28 = scalar_lea.sflag (!%p3904_p11), [#allocation3], %s195_s12  ;;  %s3715_s30 = scalar_lea.vmem (!%p3904_p11), [#allocation2], %s2859_s24 }
  0x64   : > { %3498 = dma.done.wait (%p3905_p6), %s196_s28, 512  }
  0x65   : > { %3500 = vsyncadd (%p3905_p6), %s196_s28, 4294966784  ;;  %s204_s23 = sand.u32 1, %s3572_s16   ;;  %s3722_s6 = scalar_lea.vmem [#allocation4], %s2859_s24 }
  0x66   : > { %s205_s9 = scalar_lea.sflag [#allocation5], %s204_s23 }
  0x67   : > { %3502 = dma.done.wait (%p3905_p6), %s205_s9, 512  }
  0x68   : > { %3504 = vsyncadd (%p3905_p6), %s205_s9, 4294966784  ;;  %p3906_p7 = scmp.eq.s32.totalorder %s3572_s16, 0 }
  0x6a   : > { %3506 = dma.done.wait (%p3906_p7), [#allocation5], 6528   ;;  %p3907_p5 = pmov %p3906_p7 }
  0x6b   : > { %v259_v0 = vld [vmem:[#allocation6 + $0x20] sm:$0xff]  ;;  %v260_v1 = vld [vmem:[#allocation6 + $0x28] sm:$0xff]  ;;  %v261_v2 = vld [vmem:[#allocation6 + $0x30] sm:$0xff]  ;;  %vm277_vm0 = vcmask 261120   ;;  %vm853_vm1 = vcmask 130048   ;;  %vm3531_vm2 = vmmov 0  }
  0x6c   : > { %3508 = vsyncadd (%p3907_p5), [#allocation5], 4294960768  ;;  %v3247_v3 = vpack.c.bf16 %v260_v1, %v259_v0  ;;  %v262_v4 = vld [vmem:[#allocation6 + $0x38] sm:$0xff]  ;;  %v255_v5 = vld [vmem:[#allocation6] sm:$0xff]  ;;  %vm1342_vm3 = vcmask 64512   ;;  %vm1802_vm4 = vcmask 1043456  }
  0x6d   : > { %v256_v6 = vld [vmem:[#allocation6 + $0x8] sm:$0xff]  ;;  %v3251_v7 = vpack.c.bf16 %v262_v4, %v261_v2  ;;  %v243_v9 = vld [vmem:[%s3715_s30] sm:$0xff]  ;;  %v257_v12 = vld [vmem:[#allocation6 + $0x10] sm:$0xff]  ;;  %vm1798_vm5 = vcmask 31744   ;;  %vm2103_vm6 = vcmask 27648   ;;  %vm2278_vm7 = vcmask 1041408  }
  0x6e   : > { %v3239_v8 = vpack.c.bf16 %v256_v6, %v255_v5  ;;  %v247_v10 = vld [vmem:[%s3722_s6] sm:$0xff]  ;;  %3248 = vmatprep.subr.bf16.mxu1 %v3247_v3  ;;  %v258_v13 = vld [vmem:[#allocation6 + $0x18] sm:$0xff]  ;;  %v244_v14 = vld [vmem:[%s3715_s30 + $0x8] sm:$0xff]  ;;  %vm2274_vm8 = vcmask 15360   ;;  %vm2579_vm9 = vcmask 9216   ;;  %p239_p8 = scmp.lt.s32.totalorder %s3572_s16, 5 }
  0x6f   : > { %v3734_v11 = vsub.f32 %v243_v9, %v247_v10  ;;  %3250 = vmatpush3.bf16.msra.mxu1 %v3247_v3  ;;  %v248_v15 = vld [vmem:[%s3722_s6 + $0x8] sm:$0xff]  ;;  %v3243_v16 = vpack.c.bf16 %v258_v13, %v257_v12  ;;  %v245_v17 = vld [vmem:[%s3715_s30 + $0x10] sm:$0xff]  ;;  %v246_v21 = vld [vmem:[%s3715_s30 + $0x18] sm:$0xff] }
  0x70   : > { %3240 = vmatprep.subr.bf16.mxu0 %v3239_v8  ;;  %3252 = vmatprep.subr.bf16.mxu1 %v3251_v7  ;;  %v249_v18 = vld [vmem:[%s3722_s6 + $0x10] sm:$0xff]  ;;  %v252_v19 = vsub.f32 %v244_v14, %v248_v15  ;;  %v250_v22 = vld [vmem:[%s3722_s6 + $0x18] sm:$0xff]  ;;  %v267_v24 = vld [vmem:[#allocation6 + $0x60] sm:$0xff]  ;;  %s3913_s16 = smov (!%p239_p8, %s3572_s16), 5 }
  0x71   : > { %3051 = vmatprep.mubr.msk.f32.mxu1 %vm277_vm0, %v3734_v11  ;;  %3242 = vmatpush3.bf16.msra.mxu0 %v3239_v8  ;;  %v3744_v20 = vsub.f32 %v245_v17, %v249_v18  ;;  %v254_v23 = vsub.f32 %v246_v21, %v250_v22  ;;  %v268_v37 = vld [vmem:[#allocation6 + $0x68] sm:$0xff]  ;;  %v269_v38 = vld [vmem:[#allocation6 + $0x70] sm:$0xff]  ;;  %v270_v39 = vld [vmem:[#allocation6 + $0x78] sm:$0xff]  ;;  %s2862_s20 = sshll.u32 %s3913_s16, 3 }
  0x72   : > { %3037 = vmatprep.mubr.msk.f32.mxu0 %vm277_vm0, %v3734_v11  ;;  %3244 = vmatprep.subr.bf16.mxu0 %v3243_v16  ;;  %v263_v40 = vld [vmem:[#allocation6 + $0x40] sm:$0xff]  ;;  %v264_v41 = vld [vmem:[#allocation6 + $0x48] sm:$0xff]  ;;  %v265_v42 = vld [vmem:[#allocation6 + $0x50] sm:$0xff]  ;;  %s242_s23 = scalar_lea.vmem %s3896_s3, %s2862_s20 }
  0x73   : > { %3254 = vmatpush3.bf16.msra.mxu1 %v3251_v7  ;;  %v266_v43 = vld [vmem:[#allocation6 + $0x58] sm:$0xff]  ;;  %v271_v44 = vld [vmem:[#allocation6 + $0x80] sm:$0xff]  ;;  %v272_v62 = vld [vmem:[#allocation6 + $0x88] sm:$0xff] }
  0x74   : > { %v273_v3 = vld [vmem:[#allocation6 + $0x90] sm:$0xff]  ;;  %v274_v4 = vld [vmem:[#allocation6 + $0x98] sm:$0xff]  ;;  %v275_v6 = vld [vmem:[#allocation6 + $0xa0] sm:$0xff] }
  0x75   : > { %3246 = vmatpush3.bf16.msra.mxu0 %v3243_v16  ;;  %v3279_v5 = vpack.c.bf16 %v274_v4, %v273_v3  ;;  %v276_v7 = vld [vmem:[#allocation6 + $0xa8] sm:$0xff]  ;;  %v844_v9 = vld [vmem:[#allocation6 + $0xc0] sm:$0xff]  ;;  %v843_v13 = vld [vmem:[#allocation6 + $0xb8] sm:$0xff] }
  0x76   : > { %3052 = vmatmul.mubr.msk.f32.vlgmr.msra.gmra.mrb[0].mxu1 %vm277_vm0, %v252_v19  ;;  %v3283_v8 = vpack.c.bf16 %v276_v7, %v275_v6  ;;  %v845_v10 = vld [vmem:[#allocation6 + $0xc8] sm:$0xff]  ;;  %v1338_v6 = vld [vmem:[#allocation6 + $0x118] sm:$0xff] }
  0x77   : > { %3054 = vmatprep.mubr.msk.f32.mxu1 %vm277_vm0, %v3744_v20  ;;  %v3291_v12 = vpack.c.bf16 %v845_v10, %v844_v9  ;;  %v1340_v7 = vld [vmem:[#allocation6 + $0x128] sm:$0xf] }
  0x78   : > { %3038 = vmatmul.mubr.msk.f32.vlgmr.msra.gmra.mrb[0].mxu0 %vm277_vm0, %v252_v19 }
  0x79   : > { %3040 = vmatprep.mubr.msk.f32.mxu0 %vm277_vm0, %v3744_v20 }
  0x7a   : > { %3055 = vmatmul.mubr.msk.f32.gmra.mrb[2].mxu1 %vm277_vm0, %v254_v23 }
  0x7b   : > { %3093 = vmatprep.mubr.msk.f32.mxu1 %vm277_vm0, %v271_v44 }
  0x7c   : > { %3041 = vmatmul.mubr.msk.f32.gmra.mrb[2].mxu0 %vm277_vm0, %v254_v23 }
  0x7d   : > { %3065 = vmatprep.mubr.msk.f32.mxu0 %vm277_vm0, %v267_v24 }
 0x149   : > { %v3053_v25 = vpop.f32.mrb[0].mxu1 }
 0x14a   : > { %v441_v26 = vpop.f32.mrb[1].mxu1 }
 0x14b   : > { %v3255_v27 = vpack.c.bf16 %v3053_v25, %v441_v26  ;;  %v3039_v28 = vpop.f32.mrb[0].mxu0  ;;  %v848_v26 = vld [vmem:[#allocation6 + $0xe0] sm:$0xff] }
 0x14c   : > { %v356_v29 = vpop.f32.mrb[1].mxu0 }
 0x14d   : > { %v3056_v30 = vpop.f32.mrb[2].mxu1  ;;  %3256 = vmatprep.subr.bf16.mxu0 %v3255_v27  ;;  %v3263_v31 = vpack.c.bf16 %v3039_v28, %v356_v29 }
 0x14e   : > { %v451_v32 = vpop.f32.mrb[3].mxu1  ;;  %3258 = vmatpush3.bf16.msra.mxu0 %v3255_v27 }
 0x14f   : > { %v3259_v33 = vpack.c.bf16 %v3056_v30, %v451_v32  ;;  %v3042_v34 = vpop.f32.mrb[2].mxu0 }
 0x150   : > { %v366_v35 = vpop.f32.mrb[3].mxu0 }
 0x151   : > { %3260 = vmatprep.subr.bf16.mxu0 %v3259_v33  ;;  %v3267_v36 = vpack.c.bf16 %v3042_v34, %v366_v35  ;;  %v846_v34 = vld [vmem:[#allocation6 + $0xd0] sm:$0xff]  ;;  %v847_v35 = vld [vmem:[#allocation6 + $0xd8] sm:$0xff] }
 0x152   : > { %3262 = vmatpush3.bf16.msra.mxu0 %v3259_v33  ;;  %v849_v33 = vld [vmem:[#allocation6 + $0xe8] sm:$0xff] }
 0x153   : > { %3264 = vmatprep.subr.bf16.mxu0 %v3263_v31 }
 0x155   : > { %3066 = vmatmul.mubr.msk.f32.vlgmr.msra.gmra.mrb[4].mxu0 %vm277_vm0, %v268_v37  ;;  %v3532_v37 = vmov 0.0  }
 0x156   : > { %3266 = vmatpush3.bf16.msra.mxu0 %v3263_v31  ;;  %3068 = vmatprep.mubr.msk.f32.mxu0 %vm277_vm0, %v269_v38 }
 0x157   : > { %3268 = vmatprep.subr.bf16.mxu0 %v3267_v36 }
 0x159   : > { %3069 = vmatmul.mubr.msk.f32.gmra.mrb[6].mxu0 %vm277_vm0, %v270_v39 }
 0x15a   : > { %3270 = vmatpush3.bf16.msra.mxu0 %v3267_v36  ;;  %3079 = vmatprep.mubr.msk.f32.mxu0 %vm277_vm0, %v263_v40  ;;  %v3530_v36 = vmov 0.0|0.0  }
 0x15b   : > { %3292 = vmatprep.subr.bf16.mxu0 %v3291_v12 }
 0x15d   : > { %3080 = vmatmul.mubr.msk.f32.vlgmr.msra.gmra.mrb[4].mxu0 %vm277_vm0, %v264_v41 }
 0x15e   : > { %3082 = vmatprep.mubr.msk.f32.mxu0 %vm277_vm0, %v265_v42  ;;  %3294 = vmatpush3.bf16.msra.mxu0 %v3291_v12 }
 0x15f   : > { %3303 = vmatprep.subr.bf16.mxu0 %v3530_v36 }
 0x161   : > { %3083 = vmatmul.mubr.msk.f32.gmra.mrb[6].mxu0 %vm277_vm0, %v266_v43 }
 0x230   : > { %v3081_v45 = vpop.f32.mrb[4].mxu0 }
 0x231   : > { %v655_v46 = vsub.f32 %v252_v19, %v3081_v45  ;;  %v635_v47 = vpop.f32.mrb[5].mxu0 }
 0x232   : > { %v654_v48 = vsub.f32 %v3734_v11, %v635_v47  ;;  %v3271_v49 = vpack.c.bf16 %v3081_v45, %v635_v47  ;;  %v842_v11 = vld [vmem:[#allocation6 + $0xb0] sm:$0xff] }
 0x233   : > { %v659_v50 = vand.u32 2147483647, %v655_v46  ;;  %v3287_v14 = vpack.c.bf16 %v843_v13, %v842_v11  ;;  %v850_v45 = vld [vmem:[#allocation6 + $0xf0] sm:$0xff] }
 0x234   : > { %v658_v51 = vand.u32 2147483647, %v654_v48  ;;  %v3084_v52 = vpop.f32.mrb[6].mxu0  ;;  %3272 = vmatprep.subr.bf16.mxu1 %v3271_v49  ;;  %v1341_v13 = vld [vmem:[#allocation6 + $0x130] sm:$0xff] }
 0x235   : > { %v663_v53 = vsel %vm277_vm0, %v659_v50, 0.0  ;;  %v657_v54 = vsub.f32 %v254_v23, %v3084_v52  ;;  %v645_v55 = vpop.f32.mrb[7].mxu0  ;;  %3274 = vmatpush3.bf16.msra.mxu1 %v3271_v49  ;;  %v851_v49 = vld [vmem:[#allocation6 + $0xf8] sm:$0xff]  ;;  %v852_v50 = vld [vmem:[#allocation6 + $0x100] sm:$0xff] }
 0x236   : > { %v662_v56 = vsel %vm277_vm0, %v658_v51, 0.0  ;;  %v656_v57 = vsub.f32 %v3744_v20, %v645_v55  ;;  %v3275_v58 = vpack.c.bf16 %v3084_v52, %v645_v55  ;;  %v3307_v51 = vpack.c.bf16 %v852_v50, %v851_v49  ;;  %v2268_v50 = vld [vmem:[#allocation6 + $0x168] sm:$0x3] }
 0x237   : > { %v664_v59 = vadd.f32 %v663_v53, %v662_v56  ;;  %v661_v60 = vand.u32 2147483647, %v657_v54 }
 0x238   : > { %v660_v61 = vand.u32 2147483647, %v656_v57  ;;  %3276 = vmatprep.subr.bf16.mxu1 %v3275_v58 }
 0x239   : > { %3278 = vmatpush3.bf16.msra.mxu1 %v3275_v58  ;;  %v667_v1 = vsel %vm277_vm0, %v661_v60, 0.0 }
 0x23a   : > { %v665_v63 = vsel %vm277_vm0, %v660_v61, 0.0  ;;  %3280 = vmatprep.subr.bf16.mxu1 %v3279_v5  ;;  %v1336_v61 = vld [vmem:[#allocation6 + $0x108] sm:$0xff] }
 0x23b   : > { %v666_v0 = vadd.f32 %v665_v63, %v664_v59 }
 0x23c   : > { %3094 = vmatmul.mubr.msk.f32.vlgmr.msra.gmra.mrb[4].mxu1 %vm277_vm0, %v272_v62  ;;  %v1337_v62 = vld [vmem:[#allocation6 + $0x110] sm:$0xff] }
 0x23d   : > { %v668_v2 = vadd.f32 %v667_v1, %v666_v0  ;;  %3282 = vmatpush3.bf16.msra.mxu1 %v3279_v5  ;;  %v1339_v1 = vld [vmem:[#allocation6 + $0x120] sm:$0xff] }
 0x23e   : > { %3284 = vmatprep.subr.bf16.mxu1 %v3283_v8 }
 0x23f   : > { %669 = vadd.xlane.f32.xlu0 %v668_v2 }
 0x241   : > { %3286 = vmatpush3.bf16.msra.mxu1 %v3283_v8 }
 0x242   : > { %3288 = vmatprep.subr.bf16.mxu1 %v3287_v14 }
 0x2cc   : > { %v670_v15 = vpop.xlane.xlu0 %669 }
 0x2cd   : > { %v671_v16 = vrot.slane %v670_v15, 4 }
 0x2cf   : > { %v672_v17 = vadd.f32 %v671_v16, %v670_v15 }
 0x2d1   : > { %v673_v18 = vrot.slane %v672_v17, 2 }
 0x2d3   : > { %v674_v19 = vadd.f32 %v673_v18, %v672_v17 }
 0x2d5   : > { %v675_v20 = vrot.slane %v674_v19, 1 }
 0x2d7   : > { %v676_v21 = vadd.f32 %v675_v20, %v674_v19 }
 0x2d9   : > { %3321 = vpush %v676_v21 }
 0x30a   : > { %s3322_s17 = spop %3321 }
 0x30b   : > { %s678_s7 = smul.f32 0.00016276042, %s3322_s17 }
 0x30f   : > { %v3095_v22 = vpop.f32.mrb[4].mxu1 }
 0x310   : > { %v752_v23 = vpop.f32.mrb[5].mxu1 }
 0x311   : > { %3104 = vmatprep.mubr.msk.f32.mxu1 %vm277_vm0, %v752_v23  ;;  %v1792_v23 = vld [vmem:[#allocation6 + $0x138] sm:$0xf] }
 0x312   : > { %3105 = vmatmul.mubr.msk.f32.vlgmr.msra.gmra.mrb[6].mxu1 %vm277_vm0, %v3095_v22 }
 0x313   : > { %3290 = vmatpush3.bf16.msra.mxu1 %v3287_v14 }
 0x3e5   : > { %v3106_v24 = vpop.f32.mrb[6].mxu1 }
 0x3e6   : > { %v833_v25 = vpop.f32.mrb[7].mxu1 }
 0x3e7   : > { %3111 = vmatprep.mubr.msk.f32.mxu1 %vm853_vm1, %v833_v25  ;;  %3118 = vmatprep.mubr.msk.f32.mxu0 %vm853_vm1, %v833_v25 }
 0x3e8   : > { %3112 = vmatmul.mubr.msk.f32.vlgmr.msra.gmra.mrb[8].mxu1 %vm853_vm1, %v3106_v24  ;;  %3119 = vmatmul.mubr.msk.f32.vlgmr.msra.gmra.mrb[8].mxu0 %vm853_vm1, %v3106_v24 }
 0x3e9   : > { %3125 = vmatprep.mubr.msk.f32.mxu1 %vm853_vm1, %v848_v26  ;;  %3139 = vmatprep.mubr.msk.f32.mxu0 %vm3531_vm2, %v3532_v37 }
 0x4bb   : > { %v3113_v27 = vpop.f32.mrb[8].mxu1  ;;  %v3120_v28 = vpop.f32.mrb[8].mxu0 }
 0x4bc   : > { %v926_v29 = vpop.f32.mrb[9].mxu1  ;;  %v1001_v30 = vpop.f32.mrb[9].mxu0 }
 0x4bd   : > { %v3299_v31 = vpack.c.bf16 %v3113_v27, %v926_v29  ;;  %v3295_v32 = vpack.c.bf16 %v3120_v28, %v1001_v30  ;;  %v1795_v27 = vld [vmem:[#allocation6 + $0x150] sm:$0xf] }
 0x4bf   : > { %3296 = vmatprep.subr.bf16.mxu1 %v3295_v32 }
 0x4c0   : > { %3298 = vmatpush3.bf16.msra.mxu1 %v3295_v32  ;;  %v1794_v32 = vld [vmem:[#allocation6 + $0x148] sm:$0xf] }
 0x4c1   : > { %3300 = vmatprep.subr.bf16.mxu1 %v3299_v31 }
 0x4c3   : > { %3126 = vmatmul.mubr.msk.f32.vlgmr.msra.gmra.mrb[10].mxu1 %vm853_vm1, %v849_v33  ;;  %v1796_v33 = vld [vmem:[#allocation6 + $0x158] sm:$0x3] }
 0x4c4   : > { %3302 = vmatpush3.bf16.msra.mxu1 %v3299_v31  ;;  %3132 = vmatprep.mubr.msk.f32.mxu1 %vm853_vm1, %v846_v34 }
 0x4c5   : > { %3149 = vmatprep.subr.mxu1 %v3532_v37 }
 0x4cb   : > { %3133 = vmatmul.mubr.msk.f32.vlgmr.msra.gmra.mrb[10].mxu1 %vm853_vm1, %v847_v35 }
 0x4cc   : > { %3151 = vmatprep.mubr.msk.f32.mxu1 %vm3531_vm2, %v3532_v37  ;;  %3150 = vmatpush3.msra.mxu1 %v1336_v61 }
 0x4cd   : > { %3159 = vmatprep.subr.mxu1 %v3532_v37 }
 0x59e   : > { %v3134_v38 = vpop.f32.mrb[10].mxu1 }
 0x59f   : > { %v1173_v39 = vsub.f32 %v3106_v24, %v3134_v38  ;;  %v1163_v40 = vpop.f32.mrb[11].mxu1  ;;  %v1793_v24 = vld [vmem:[#allocation6 + $0x140] sm:$0xf] }
 0x5a0   : > { %v1172_v41 = vsub.f32 %v833_v25, %v1163_v40  ;;  %v3304_v42 = vpack.c.bf16 %v3134_v38, %v1163_v40  ;;  %v1797_v40 = vld [vmem:[#allocation6 + $0x160] sm:$0xf] }
 0x5a1   : > { %v1175_v43 = vand.u32 2147483647, %v1173_v39 }
 0x5a2   : > { %v1174_v44 = vand.u32 2147483647, %v1172_v41  ;;  %3305 = vmatpush3.bf16.msra.mxu0 %v3304_v42 }
 0x5a3   : > { %v1177_v46 = vsel %vm853_vm1, %v1175_v43, 0.0  ;;  %3306 = vmatprep.subr.bf16.mxu0 %v3530_v36 }
 0x5a4   : > { %v1176_v47 = vsel %vm853_vm1, %v1174_v44, 0.0 }
 0x5a5   : > { %3140 = vmatmul.mubr.msk.f32.vlgmr.msra.gmra.mrb[10].mxu0 %vm853_vm1, %v850_v45  ;;  %v1178_v48 = vadd.f32 %v1177_v46, %v1176_v47 }
 0x5a6   : > { %3146 = vmatprep.mubr.msk.f32.mxu0 %vm3531_vm2, %v3532_v37  ;;  %3308 = vmatpush3.bf16.msra.mxu0 %v3307_v51  ;;  %v2269_v51 = vld [vmem:[#allocation6 + $0x170] sm:$0x3] }
 0x5a7   : > { %1179 = vadd.xlane.f32.xlu0 %v1178_v48  ;;  %3154 = vmatprep.subr.mxu0 %v3532_v37 }
 0x634   : > { %v1180_v52 = vpop.xlane.xlu0 %1179 }
 0x635   : > { %v1181_v53 = vrot.slane %v1180_v52, 4 }
 0x637   : > { %v1182_v54 = vadd.f32 %v1181_v53, %v1180_v52 }
 0x639   : > { %v1183_v55 = vrot.slane %v1182_v54, 2 }
 0x63b   : > { %v1184_v56 = vadd.f32 %v1183_v55, %v1182_v54  ;;  %v2271_v54 = vld [vmem:[#allocation6 + $0x180] sm:$0x3] }
 0x63d   : > { %v1185_v57 = vrot.slane %v1184_v56, 1 }
 0x63f   : > { %v1186_v58 = vadd.f32 %v1185_v57, %v1184_v56 }
 0x641   : > { %3323 = vpush %v1186_v58 }
 0x672   : > { %s3324_s18 = spop %3323 }
 0x673   : > { %s1188_s4 = smul.f32 0.0006510417, %s3324_s18 }
 0x675   : > { %s1189_s27 = sadd.f32 %s1188_s4, %s678_s7 }
 0x678   : > { %v1259_v59 = vpop.f32.mrb[10].mxu0 }
 0x679   : > { %v3141_v60 = vpop.f32.mrb[11].mxu0  ;;  %3147 = vmatmul.mubr.msk.f32.vlgmr.msra.gmra.mrb[12].mxu0 %vm853_vm1, %v1259_v59  ;;  %v2270_v59 = vld [vmem:[#allocation6 + $0x178] sm:$0x3] }
 0x67a   : > { %3156 = vmatprep.mubr.msk.f32.mxu0 %vm3531_vm2, %v3532_v37  ;;  %3155 = vmatpush3.msra.mxu0 %v1337_v62  ;;  %v2272_v60 = vld [vmem:[#allocation6 + $0x188] sm:$0x1] }
 0x67b   : > { %3169 = vmatprep.subr.mxu0 %v3532_v37 }
 0x74c   : > { %v1332_v63 = vpop.f32.mrb[12].mxu0 }
 0x74d   : > { %v3148_v0 = vpop.f32.mrb[13].mxu0  ;;  %3152 = vmatmul.mubr.msk.f32.vlgmr.msra.gmra.mrb[12].mxu1 %vm1342_vm3, %v1332_v63  ;;  %3157 = vmatmul.mubr.msk.f32.vlgmr.msra.gmra.mrb[14].mxu0 %vm1342_vm3, %v1332_v63 }
 0x74e   : > { %3161 = vmatprep.mubr.msk.f32.mxu1 %vm3531_vm2, %v3532_v37  ;;  %3171 = vmatprep.mubr.msk.f32.mxu0 %vm3531_vm2, %v3532_v37 }
 0x820   : > { %v1412_v2 = vpop.f32.mrb[12].mxu1  ;;  %v1482_v3 = vpop.f32.mrb[14].mxu0 }
 0x821   : > { %v3153_v4 = vpop.f32.mrb[13].mxu1  ;;  %v3158_v5 = vpop.f32.mrb[15].mxu0  ;;  %3160 = vmatpush3.msra.mxu1 %v1482_v3 }
 0x822   : > { %3162 = vmatmul.mubr.msk.f32.vlgmr.msra.gmra.mrb[14].mxu1 %vm1342_vm3, %v1339_v1  ;;  %3164 = vmatprep.subr.mxu1 %v3532_v37 }
 0x823   : > { %3165 = vmatpush3.msra.mxu1 %v1412_v2  ;;  %3166 = vmatprep.mubr.msk.f32.mxu1 %vm3531_vm2, %v3532_v37  ;;  %v2273_v2 = vld [vmem:[#allocation6 + $0x190] sm:$0x3] }
 0x824   : > { %3179 = vmatprep.subr.mxu1 %v3532_v37 }
 0x82a   : > { %3167 = vmatmul.mubr.msk.f32.vlgmr.msra.gmra.mrb[14].mxu1 %vm1342_vm3, %v1338_v6 }
 0x82b   : > { %3181 = vmatprep.mubr.msk.f32.mxu1 %vm3531_vm2, %v3532_v37  ;;  %3180 = vmatpush3.msk.msra.mxu1 %vm1802_vm4, %v1792_v23 }
 0x82c   : > { %3189 = vmatprep.subr.mxu1 %v3532_v37 }
 0x8fd   : > { %v1628_v8 = vpop.f32.mrb[14].mxu1 }
 0x8fe   : > { %v1632_v9 = vsub.f32 %v1332_v63, %v1628_v8  ;;  %v3168_v10 = vpop.f32.mrb[15].mxu1  ;;  %3170 = vmatpush3.msra.mxu0 %v1628_v8 }
 0x8ff   : > { %3172 = vmatmul.mubr.msk.f32.vlgmr.msra.gmra.mrb[16].mxu0 %vm1342_vm3, %v1340_v7  ;;  %3174 = vmatprep.subr.mxu0 %v3532_v37 }
 0x900   : > { %v1633_v11 = vand.u32 2147483647, %v1632_v9  ;;  %3176 = vmatprep.mubr.msk.f32.mxu0 %vm3531_vm2, %v3532_v37  ;;  %3175 = vmatpush3.msra.mxu0 %v1341_v13 }
 0x901   : > { %3184 = vmatprep.subr.mxu0 %v3532_v37 }
 0x902   : > { %v1634_v12 = vsel %vm1342_vm3, %v1633_v11, 0.0 }
 0x903   : > { %1635 = vadd.xlane.f32.xlu1 %v1634_v12 }
 0x990   : > { %v1636_v14 = vpop.xlane.xlu1 %1635 }
 0x991   : > { %v1637_v15 = vrot.slane %v1636_v14, 4 }
 0x993   : > { %v1638_v16 = vadd.f32 %v1637_v15, %v1636_v14 }
 0x995   : > { %v1639_v17 = vrot.slane %v1638_v16, 2 }
 0x997   : > { %v1640_v18 = vadd.f32 %v1639_v17, %v1638_v16 }
 0x999   : > { %v1641_v19 = vrot.slane %v1640_v18, 1 }
 0x99b   : > { %v1642_v20 = vadd.f32 %v1641_v19, %v1640_v18 }
 0x99d   : > { %3325 = vpush %v1642_v20 }
 0x9ce   : > { %s3326_s29 = spop %3325 }
 0x9cf   : > { %s1644_s25 = smul.f32 0.0026041667, %s3326_s29 }
 0x9d1   : > { %s1645_s11 = sadd.f32 %s1644_s25, %s1189_s27 }
 0x9d2   : > { %v1715_v21 = vpop.f32.mrb[16].mxu0 }
 0x9d3   : > { %v3173_v22 = vpop.f32.mrb[17].mxu0  ;;  %3177 = vmatmul.mubr.msk.f32.vlgmr.msra.gmra.mrb[18].mxu0 %vm1342_vm3, %v1715_v21 }
 0x9d4   : > { %3186 = vmatprep.mubr.msk.f32.mxu0 %vm3531_vm2, %v3532_v37  ;;  %3185 = vmatpush3.msk.msra.mxu0 %vm1802_vm4, %v1793_v24 }
 0x9d5   : > { %3199 = vmatprep.subr.mxu0 %v3532_v37 }
 0xaa6   : > { %v1788_v25 = vpop.f32.mrb[18].mxu0 }
 0xaa7   : > { %v3178_v26 = vpop.f32.mrb[19].mxu0  ;;  %3182 = vmatmul.mubr.msk.f32.vlgmr.msra.gmra.mrb[16].mxu1 %vm1798_vm5, %v1788_v25  ;;  %3187 = vmatmul.mubr.msk.f32.vlgmr.msra.gmra.mrb[20].mxu0 %vm1798_vm5, %v1788_v25 }
 0xaa8   : > { %3191 = vmatprep.mubr.msk.f32.mxu1 %vm3531_vm2, %v3532_v37  ;;  %3201 = vmatprep.mubr.msk.f32.mxu0 %vm3531_vm2, %v3532_v37 }
 0xb7a   : > { %v1872_v28 = vpop.f32.mrb[16].mxu1  ;;  %v1945_v29 = vpop.f32.mrb[20].mxu0 }
 0xb7b   : > { %v3183_v30 = vpop.f32.mrb[17].mxu1  ;;  %v3188_v31 = vpop.f32.mrb[21].mxu0  ;;  %3190 = vmatpush3.msk.msra.mxu1 %vm1802_vm4, %v1945_v29 }
 0xb7c   : > { %3192 = vmatmul.mubr.msk.f32.vlgmr.msra.gmra.mrb[18].mxu1 %vm1798_vm5, %v1795_v27  ;;  %3194 = vmatprep.subr.mxu1 %v3532_v37 }
 0xb7d   : > { %3195 = vmatpush3.msk.msra.mxu1 %vm1802_vm4, %v1872_v28  ;;  %3196 = vmatprep.mubr.msk.f32.mxu1 %vm3531_vm2, %v3532_v37 }
 0xb7e   : > { %3209 = vmatprep.subr.mxu1 %v3532_v37 }
 0xb84   : > { %3197 = vmatmul.mubr.msk.f32.vlgmr.msra.gmra.mrb[18].mxu1 %vm1798_vm5, %v1794_v32 }
 0xb85   : > { %3211 = vmatprep.mubr.msk.f32.mxu1 %vm3531_vm2, %v3532_v37  ;;  %3210 = vmatpush3.msk.msra.mxu1 %vm2278_vm7, %v2268_v50 }
 0xb86   : > { %3219 = vmatprep.subr.mxu1 %v3532_v37 }
 0xc57   : > { %v2097_v34 = vpop.f32.mrb[18].mxu1 }
 0xc58   : > { %v2101_v35 = vsub.f32 %v1788_v25, %v2097_v34  ;;  %v3198_v36 = vpop.f32.mrb[19].mxu1  ;;  %3200 = vmatpush3.msk.msra.mxu0 %vm1802_vm4, %v2097_v34 }
 0xc59   : > { %3202 = vmatmul.mubr.msk.f32.vlgmr.msra.gmra.mrb[22].mxu0 %vm1798_vm5, %v1796_v33  ;;  %3204 = vmatprep.subr.mxu0 %v3532_v37 }
 0xc5a   : > { %v2102_v38 = vand.u32 2147483647, %v2101_v35  ;;  %3206 = vmatprep.mubr.msk.f32.mxu0 %vm3531_vm2, %v3532_v37  ;;  %3205 = vmatpush3.msk.msra.mxu0 %vm1802_vm4, %v1797_v40 }
 0xc5b   : > { %3214 = vmatprep.subr.mxu0 %v3532_v37 }
 0xc5c   : > { %v2104_v39 = vsel %vm2103_vm6, %v2102_v38, 0.0 }
 0xc5d   : > { %2105 = vadd.xlane.f32.xlu1 %v2104_v39 }
 0xcea   : > { %v2106_v41 = vpop.xlane.xlu1 %2105 }
 0xceb   : > { %v2107_v42 = vrot.slane %v2106_v41, 4 }
 0xced   : > { %v2108_v43 = vadd.f32 %v2107_v42, %v2106_v41 }
 0xcef   : > { %v2109_v44 = vrot.slane %v2108_v43, 2 }
 0xcf1   : > { %v2110_v45 = vadd.f32 %v2109_v44, %v2108_v43 }
 0xcf3   : > { %v2111_v46 = vrot.slane %v2110_v45, 1 }
 0xcf5   : > { %v2112_v47 = vadd.f32 %v2111_v46, %v2110_v45 }
 0xcf7   : > { %3327 = vpush %v2112_v47 }
 0xd28   : > { %s3328_s8 = spop %3327 }
 0xd29   : > { %s2114_s19 = smul.f32 0.010416667, %s3328_s8 }
 0xd2b   : > { %s2115_s21 = sadd.f32 %s2114_s19, %s1645_s11 }
 0xd2c   : > { %v2188_v48 = vpop.f32.mrb[22].mxu0 }
 0xd2d   : > { %v3203_v49 = vpop.f32.mrb[23].mxu0  ;;  %3207 = vmatmul.mubr.msk.f32.vlgmr.msra.gmra.mrb[24].mxu0 %vm1798_vm5, %v2188_v48 }
 0xd2e   : > { %3216 = vmatprep.mubr.msk.f32.mxu0 %vm3531_vm2, %v3532_v37  ;;  %3215 = vmatpush3.msk.msra.mxu0 %vm2278_vm7, %v2269_v51 }
 0xd2f   : > { %3229 = vmatprep.subr.mxu0 %v3532_v37 }
 0xe00   : > { %v2264_v52 = vpop.f32.mrb[24].mxu0 }
 0xe01   : > { %v3208_v53 = vpop.f32.mrb[25].mxu0  ;;  %3212 = vmatmul.mubr.msk.f32.vlgmr.msra.gmra.mrb[20].mxu1 %vm2274_vm8, %v2264_v52  ;;  %3217 = vmatmul.mubr.msk.f32.vlgmr.msra.gmra.mrb[26].mxu0 %vm2274_vm8, %v2264_v52 }
 0xe02   : > { %3221 = vmatprep.mubr.msk.f32.mxu1 %vm3531_vm2, %v3532_v37  ;;  %3231 = vmatprep.mubr.msk.f32.mxu0 %vm3531_vm2, %v3532_v37 }
 0xed4   : > { %v2348_v55 = vpop.f32.mrb[20].mxu1  ;;  %v2421_v56 = vpop.f32.mrb[26].mxu0 }
 0xed5   : > { %v3213_v57 = vpop.f32.mrb[21].mxu1  ;;  %v3218_v58 = vpop.f32.mrb[27].mxu0  ;;  %3220 = vmatpush3.msk.msra.mxu1 %vm2278_vm7, %v2421_v56 }
 0xed6   : > { %3222 = vmatmul.mubr.msk.f32.vlgmr.msra.gmra.mrb[22].mxu1 %vm2274_vm8, %v2271_v54  ;;  %3224 = vmatprep.subr.mxu1 %v3532_v37 }
 0xed7   : > { %3225 = vmatpush3.msk.msra.mxu1 %vm2278_vm7, %v2348_v55  ;;  %3226 = vmatprep.mubr.msk.f32.mxu1 %vm3531_vm2, %v3532_v37 }
 0xede   : > { %3227 = vmatmul.mubr.msk.f32.vlgmr.msra.gmra.mrb[22].mxu1 %vm2274_vm8, %v2270_v59 }
 0xfb1   : > { %v2573_v61 = vpop.f32.mrb[22].mxu1 }
 0xfb2   : > { %v2577_v62 = vsub.f32 %v2264_v52, %v2573_v61  ;;  %v3228_v63 = vpop.f32.mrb[23].mxu1  ;;  %3230 = vmatpush3.msk.msra.mxu0 %vm2278_vm7, %v2573_v61 }
 0xfb3   : > { %3232 = vmatmul.mubr.msk.f32.vlgmr.msra.gmra.mrb[28].mxu0 %vm2274_vm8, %v2272_v60  ;;  %3234 = vmatprep.subr.mxu0 %v3532_v37 }
 0xfb4   : > { %v2578_v0 = vand.u32 2147483647, %v2577_v62  ;;  %3236 = vmatprep.mubr.msk.f32.mxu0 %vm3531_vm2, %v3532_v37  ;;  %3235 = vmatpush3.msk.msra.mxu0 %vm2278_vm7, %v2273_v2 }
 0xfb6   : > { %v2580_v1 = vsel %vm2579_vm9, %v2578_v0, 0.0 }
 0xfb7   : > { %2581 = vadd.xlane.f32.xlu0 %v2580_v1 }
0x1044   : > { %v2582_v3 = vpop.xlane.xlu0 %2581 }
0x1045   : > { %v2583_v4 = vrot.slane %v2582_v3, 4 }
0x1047   : > { %v2584_v5 = vadd.f32 %v2583_v4, %v2582_v3 }
0x1049   : > { %v2585_v6 = vrot.slane %v2584_v5, 2 }
0x104b   : > { %v2586_v7 = vadd.f32 %v2585_v6, %v2584_v5 }
0x104d   : > { %v2587_v8 = vrot.slane %v2586_v7, 1 }
0x104f   : > { %v2588_v9 = vadd.f32 %v2587_v8, %v2586_v7 }
0x1051   : > { %3329 = vpush %v2588_v9 }
0x1082   : > { %s3330_s26 = spop %3329 }
0x1083   : > { %s2590_s15 = smul.f32 0.041666668, %s3330_s26 }
0x1085   : > { %s2591_s12 = sadd.f32 %s2590_s15, %s2115_s21 }
0x1086   : > { %v2664_v10 = vpop.f32.mrb[28].mxu0 }
0x1087   : > { %3237 = vmatmul.mubr.msk.f32.vlgmr.msra.gmra.mrb[30].mxu0 %vm2274_vm8, %v2664_v10  ;;  %v3233_v11 = vpop.f32.mrb[29].mxu0 }
0x115a   : > { %v2740_v37 = vpop.f32.mrb[30].mxu0 }
0x115b   : > { %v2744_v12 = vand.u32 2147483647, %v2740_v37  ;;  %v3238_v13 = vpop.f32.mrb[31].mxu0 }
0x115d   : > { %3331 = vpush %v2744_v12 }
0x118e   : > { %s3332_s5 = spop %3331 }
0x118f   : > { %s2747_s24 = smul.f32 0.16666667, %s3332_s5 }
0x1191   : > { %s2748_s9 = sadd.f32 %s2747_s24, %s2591_s12 }
0x1193   : > { %v2749_v14 = vstv %s2748_s9 }
0x1194   : > { %2750 = vst [vmem:[%s242_s23] sm:$0xff] %v2749_v14 }
0x1195 PF: > { %p16_p9 = scmp.ge.s32.totalorder %s3597_s22, 8   ;;  %s3908_s12 = smov %s3515_s13 }
0x1196   : > { %s3909_s13 = smov %s3519_s14  ;;  %s3910_s14 = smov %s3626_s10 }
0x1197   : > { %s3911_s15 = smov %s3597_s22  ;;  %18 = sbr.rel (!%p16_p9) target bundleno = 5 (0x5), region = 89 }
0x119e   :  { %2770 = vsyncpa [#allocation3], 1 }
0x119f   :  { %2772 = vsyncpa [#allocation3 + $0x1], 1 }
0x11a0   :  { %2773 = vsyncpa [#allocation5], 1 }
0x11a1   :  { %2775 = vsyncpa [#allocation5 + $0x1], 1 }

</bundles_post_ra>
